<compile_context>
chip_gen: v5e
topology: v5e:2x2
jax: 0.10.0
libtpu: 0.0.40
codegen_flags: <defaults>
</compile_context>

<pallas_src>
import jax
import jax.numpy as jnp
from jax.experimental import pallas as pl
from jax.experimental.pallas import tpu as pltpu


def _round_up(a, m):
    return ((a + m - 1) // m) * m


def _pick_chunk(tb, max_steps=16):
    """Largest-amortization inner chunk: smallest 128*2^k that divides `tb`
    with at most `max_steps` inner iterations; falls back to the whole tile."""
    c = 128
    while c <= tb:
        if tb % c == 0 and tb // c <= max_steps:
            return c
        c *= 2
    return tb


def make_mlp_kernel(chunk):
    def mlp_kernel(xt_ref, w1_ref, b1_ref, w2_ref, b2_ref, w3_ref, b3_ref, o_ref):
        # xt_ref : (16, TB)  bf16  streamed batch tile, batch in lanes
        # w1     : (64, 16)  bf16   b1: (64, 1) f32   (resident in VMEM)
        # w2     : (32, 64)  bf16   b2: (32, 1) f32
        # w3     : (1, 32)   bf16   b3: (1, 1)  f32
        # o_ref  : (1, TB)   f32    lane-dense output row
        tb = o_ref.shape[1]
        n_chunks = tb // chunk

        # Hoist the (tiny) resident weights once per grid step.
        w1 = w1_ref[...]
        b1 = b1_ref[...]
        w2 = w2_ref[...]
        b2 = b2_ref[...]
        w3 = w3_ref[...]
        b3 = b3_ref[...]

        # Statically unrolled sub-chunk loop: activation footprint stays
        # O(chunk) while the DMA tile (TB) amortizes per-grid-step overhead.
        for c in range(n_chunks):
            sl = slice(c * chunk, (c + 1) * chunk)
            x = xt_ref[:, sl]                                   # (16, chunk) bf16

            # Layer 1: Linear(16, 64) + ReLU   (bf16 MXU, f32 accumulation)
            h1 = jnp.dot(w1, x, preferred_element_type=jnp.float32) + b1
            h1 = jnp.maximum(h1, 0.0).astype(jnp.bfloat16)      # (64, chunk)
            # Dropout(p=0.2): identity in eval mode.

            # Layer 2: Linear(64, 32) + SiLU   (bf16 MXU, f32 accumulation)
            h2 = jnp.dot(w2, h1, preferred_element_type=jnp.float32) + b2
            h2 = (h2 * jax.nn.sigmoid(h2)).astype(jnp.bfloat16)  # (32, chunk)
            # Dropout(p=0.2): identity in eval mode.

            # Layer 3: Linear(32, 1), lane-dense output, no transposed contraction.
            out = jnp.dot(w3, h2, preferred_element_type=jnp.float32) + b3
            o_ref[:, sl] = out.astype(o_ref.dtype)              # (1, chunk)

    return mlp_kernel


def neural_network_forward(x, params, *, tile_b=8192):
    """x: (B, 16) (bf16 or f32).  params: kernel-layout dict from prepare_params().
    Returns (B, 1) float32 logits.

    For peak bandwidth the caller should ideally produce x feature-major
    (16, B); this wrapper accepts the PyTorch-style (B, 16) and transposes once.
    """
    B, F = x.shape
    assert F == 16
    assert tile_b % 128 == 0 and tile_b >= 128

    # --- per-call tile selection (lane-dense: everything is a multiple of 128) ---
    B128 = _round_up(B, 128)
    if B128 >= 2 * tile_b:
        TB = tile_b                      # large batch: fixed big tiles
    elif B128 >= 256 and B128 % 256 == 0:
        TB = B128 // 2                   # >=2 tiles -> megacore sharding on v7x
    else:
        TB = B128                        # single tile
    B_pad = _round_up(B, TB)
    n_tiles = B_pad // TB
    chunk = _pick_chunk(TB)

    # Feature-major, batch-in-lanes layout; pad batch (lanes) to B_pad.
    xt = jnp.pad(x.T, ((0, 0), (0, B_pad - B)))          # (16, B_pad)

    w1, b1 = params["w1t"], params["b1"]
    w2, b2 = params["w2t"], params["b2"]
    w3, b3 = params["w3t"], params["b3"]

    const = lambda i: (0, 0)                              # weights/biases stay resident

    # VMEM budget: double-buffered x + out blocks, per-chunk activations, headroom.
    x_blk = 16 * TB * 2                                   # bf16 x tile
    out_blk = 8 * TB * 4                                  # (1, TB) f32, sublane-padded to 8
    act = (64 + 32) * chunk * 4 * 4                       # generous activation/spill budget
    vmem_limit = 2 * x_blk + 2 * out_blk + act + (4 << 20)
    vmem_limit = int(min(max(vmem_limit, 16 << 20), 48 << 20))   # safe on v5e/v6e/v7x

    out_row = pl.pallas_call(
        make_mlp_kernel(chunk),
        out_shape=jax.ShapeDtypeStruct((1, B_pad), jnp.float32),
        grid=(n_tiles,),
        in_specs=[
            pl.BlockSpec((16, TB), lambda i: (0, i)),     # streamed, double-buffered
            pl.BlockSpec(w1.shape, const),
            pl.BlockSpec(b1.shape, const),
            pl.BlockSpec(w2.shape, const),
            pl.BlockSpec(b2.shape, const),
            pl.BlockSpec(w3.shape, const),
            pl.BlockSpec(b3.shape, const),
        ],
        out_specs=pl.BlockSpec((1, TB), lambda i: (0, i)),
        compiler_params=pltpu.CompilerParams(
            dimension_semantics=("parallel",),            # megacore sharding on v7x
            vmem_limit_bytes=vmem_limit,
        ),
    )(xt, w1, b1, w2, b2, w3, b3)

    return out_row[0, :B].reshape(B, 1)


# ----------------------------- parameters / reference -----------------------------

def init_params(key):
    """Deterministic synthetic parameters matching the PyTorch module's shapes,
    stored (in_features, out_features)."""
    k1, k2, k3, k4, k5, k6 = jax.random.split(key, 6)
    w1 = jax.random.normal(k1, (16, 64), jnp.float32) * (1.0 / jnp.sqrt(16.0))
    b1 = jax.random.normal(k2, (1, 64), jnp.float32) * 0.01
    w2 = jax.random.normal(k3, (64, 32), jnp.float32) * (1.0 / jnp.sqrt(64.0))
    b2 = jax.random.normal(k4, (1, 32), jnp.float32) * 0.01
    w3 = jax.random.normal(k5, (32, 1), jnp.float32) * (1.0 / jnp.sqrt(32.0))
    b3 = jax.random.normal(k6, (1, 1), jnp.float32) * 0.01
    return {"w1": w1, "b1": b1, "w2": w2, "b2": b2, "w3": w3, "b3": b3}


def prepare_params(p):
    """Kernel layout: transposed bf16 weight matrices (out, in), f32 column biases."""
    return {
        "w1t": p["w1"].T.astype(jnp.bfloat16),            # (64, 16)
        "b1": p["b1"].reshape(64, 1).astype(jnp.float32),
        "w2t": p["w2"].T.astype(jnp.bfloat16),            # (32, 64)
        "b2": p["b2"].reshape(32, 1).astype(jnp.float32),
        "w3t": p["w3"].T.astype(jnp.bfloat16),            # (1, 32)
        "b3": p["b3"].reshape(1, 1).astype(jnp.float32),
    }


def reference_params(p):
    """f32 reference uses the same bf16-rounded weight values (f32 math)."""
    q = dict(p)
    for n in ("w1", "w2", "w3"):
        q[n] = p[n].astype(jnp.bfloat16).astype(jnp.float32)
    return q


def reference_forward(x, p):
    h1 = jnp.maximum(x @ p["w1"] + p["b1"], 0.0)
    h2 = h1 @ p["w2"] + p["b2"]
    h2 = h2 * jax.nn.sigmoid(h2)
    return h2 @ p["w3"] + p["b3"]


# ------------------------------------- main -------------------------------------

if __name__ == "__main__":
    key = jax.random.PRNGKey(0)
    kx1, kx2, kx3, kp = jax.random.split(key, 4)

    params_f32 = init_params(kp)
    kparams = prepare_params(params_f32)
    rparams = reference_params(params_f32)

    def check(x_bf16, out, label):
        ref = reference_forward(x_bf16.astype(jnp.float32), rparams)
        assert out.shape == ref.shape, (label, out.shape, ref.shape)
        assert jnp.allclose(out, ref, atol=1e-2, rtol=1e-2), f"mismatch vs reference ({label})"

    # --- tiny single-tile run (B=8 -> TB=128, 1 tile, 1 chunk) ---
    B1 = 8
    x1 = jax.random.normal(kx1, (B1, 16), jnp.float32).astype(jnp.bfloat16)
    o1 = jax.block_until_ready(neural_network_forward(x1, kparams))
    check(x1, o1, "B=8")

    # --- multi-tile run exercising padding + pipelined batch grid (3 tiles) ---
    B2 = 300
    x2 = jax.random.normal(kx2, (B2, 16), jnp.float32).astype(jnp.bfloat16)
    o2 = jax.block_until_ready(neural_network_forward(x2, kparams, tile_b=128))
    check(x2, o2, "B=300, tile_b=128")

    # --- 2-tile megacore split + inner chunk path (B=512 -> TB=256, 2 tiles) ---
    B3 = 512
    x3 = jax.random.normal(kx3, (B3, 16), jnp.float32).astype(jnp.bfloat16)
    o3 = jax.block_until_ready(neural_network_forward(x3, kparams))
    check(x3, o3, "B=512")

    print("KERNEL_OK")
</pallas_src>

<mosaic_0001>
module attributes {stable_mosaic.version = 11 : i64} {
  func.func @mlp_kernel(%arg0: i32, %arg1: memref<16x128xbf16, #tpu.memory_space<vmem>>, %arg2: memref<64x16xbf16, #tpu.memory_space<vmem>>, %arg3: memref<64x1xf32, #tpu.memory_space<vmem>>, %arg4: memref<32x64xbf16, #tpu.memory_space<vmem>>, %arg5: memref<32x1xf32, #tpu.memory_space<vmem>>, %arg6: memref<1x32xbf16, #tpu.memory_space<vmem>>, %arg7: memref<1x1xf32, #tpu.memory_space<vmem>>, %arg8: memref<1x128xf32, #tpu.memory_space<vmem>>) attributes {dimension_semantics = [#tpu.dimension_semantics<parallel>], iteration_bounds = array<i64: 1>, scalar_prefetch = 0 : i64, scratch_operands = 0 : i64, tpu.core_type = #tpu.core_type<tc>, window_params = [{transform_indices = @transform_0, window_bounds = array<i64: 16, 128>}, {pipeline_mode = #tpu.pipeline_mode<synchronous>, transform_indices = @transform_1, window_bounds = array<i64: 64, 16>}, {pipeline_mode = #tpu.pipeline_mode<synchronous>, transform_indices = @transform_2, window_bounds = array<i64: 64, 1>}, {pipeline_mode = #tpu.pipeline_mode<synchronous>, transform_indices = @transform_3, window_bounds = array<i64: 32, 64>}, {pipeline_mode = #tpu.pipeline_mode<synchronous>, transform_indices = @transform_4, window_bounds = array<i64: 32, 1>}, {pipeline_mode = #tpu.pipeline_mode<synchronous>, transform_indices = @transform_5, window_bounds = array<i64: 1, 32>}, {pipeline_mode = #tpu.pipeline_mode<synchronous>, transform_indices = @transform_6, window_bounds = array<i64: 1, 1>}, {transform_indices = @transform_7, window_bounds = array<i64: 1, 128>}]} {
    %c0 = arith.constant 0 : index
    %c0_0 = arith.constant 0 : index
    %0 = vector.load %arg2[%c0, %c0_0] : memref<64x16xbf16, #tpu.memory_space<vmem>>, vector<64x16xbf16>
    %c0_1 = arith.constant 0 : index
    %c0_2 = arith.constant 0 : index
    %1 = vector.load %arg3[%c0_1, %c0_2] : memref<64x1xf32, #tpu.memory_space<vmem>>, vector<64x1xf32>
    %c0_3 = arith.constant 0 : index
    %c0_4 = arith.constant 0 : index
    %2 = vector.load %arg4[%c0_3, %c0_4] : memref<32x64xbf16, #tpu.memory_space<vmem>>, vector<32x64xbf16>
    %c0_5 = arith.constant 0 : index
    %c0_6 = arith.constant 0 : index
    %3 = vector.load %arg5[%c0_5, %c0_6] : memref<32x1xf32, #tpu.memory_space<vmem>>, vector<32x1xf32>
    %c0_7 = arith.constant 0 : index
    %c0_8 = arith.constant 0 : index
    %4 = vector.load %arg6[%c0_7, %c0_8] : memref<1x32xbf16, #tpu.memory_space<vmem>>, vector<1x32xbf16>
    %c0_9 = arith.constant 0 : index
    %c0_10 = arith.constant 0 : index
    %5 = vector.load %arg7[%c0_9, %c0_10] : memref<1x1xf32, #tpu.memory_space<vmem>>, vector<1x1xf32>
    %c0_11 = arith.constant 0 : index
    %c0_12 = arith.constant 0 : index
    %6 = vector.load %arg1[%c0_11, %c0_12] : memref<16x128xbf16, #tpu.memory_space<vmem>>, vector<16x128xbf16>
    %cst = arith.constant dense<0.000000e+00> : vector<64x128xf32>
    %7 = tpu.matmul %0, %6, %cst {dimension_numbers = #tpu.dot_dimension_numbers<[1], [0], [0], [1], [0, 0, 1, 1], [], []>} : vector<64x16xbf16>, vector<16x128xbf16>, vector<64x128xf32> -> vector<64x128xf32>
    %8 = vector.broadcast %1 : vector<64x1xf32> to vector<64x128xf32>
    %9 = arith.addf %7, %8 : vector<64x128xf32>
    %cst_13 = arith.constant 0.000000e+00 : f32
    %10 = vector.broadcast %cst_13 : f32 to vector<64x128xf32>
    %11 = arith.maximumf %9, %10 : vector<64x128xf32>
    %12 = arith.truncf %11 : vector<64x128xf32> to vector<64x128xbf16>
    %cst_14 = arith.constant dense<0.000000e+00> : vector<32x128xf32>
    %13 = tpu.matmul %2, %12, %cst_14 {dimension_numbers = #tpu.dot_dimension_numbers<[1], [0], [0], [1], [0, 0, 1, 1], [], []>} : vector<32x64xbf16>, vector<64x128xbf16>, vector<32x128xf32> -> vector<32x128xf32>
    %14 = vector.broadcast %3 : vector<32x1xf32> to vector<32x128xf32>
    %15 = arith.addf %13, %14 : vector<32x128xf32>
    %16 = arith.negf %15 : vector<32x128xf32>
    %17 = math.exp %16 : vector<32x128xf32>
    %cst_15 = arith.constant 1.000000e+00 : f32
    %18 = vector.broadcast %cst_15 : f32 to vector<32x128xf32>
    %19 = arith.addf %18, %17 : vector<32x128xf32>
    %20 = arith.divf %18, %19 : vector<32x128xf32>
    %21 = arith.mulf %15, %20 : vector<32x128xf32>
    %22 = arith.truncf %21 : vector<32x128xf32> to vector<32x128xbf16>
    %cst_16 = arith.constant dense<0.000000e+00> : vector<1x128xf32>
    %23 = tpu.matmul %4, %22, %cst_16 {dimension_numbers = #tpu.dot_dimension_numbers<[1], [0], [0], [1], [0, 0, 1, 1], [], []>} : vector<1x32xbf16>, vector<32x128xbf16>, vector<1x128xf32> -> vector<1x128xf32>
    %24 = vector.broadcast %5 : vector<1x1xf32> to vector<1x128xf32>
    %25 = arith.addf %23, %24 : vector<1x128xf32>
    %c0_17 = arith.constant 0 : index
    %c0_18 = arith.constant 0 : index
    %26 = vector.load %arg8[%c0_17, %c0_18] : memref<1x128xf32, #tpu.memory_space<vmem>>, vector<1x128xf32>
    tpu.vector_store %arg8[%c0_17, %c0_18], %25 {strides = array<i32>} : memref<1x128xf32, #tpu.memory_space<vmem>>, vector<1x128xf32>,
    return
  }
  func.func @transform_0(%arg0: i32) -> (i32, i32) {
    %c0_i32 = arith.constant 0 : i32
    %c0_i32_0 = arith.constant 0 : i32
    return %c0_i32, %arg0 : i32, i32
  }
  func.func @transform_1(%arg0: i32) -> (i32, i32) {
    %c0_i32 = arith.constant 0 : i32
    %c0_i32_0 = arith.constant 0 : i32
    %c0_i32_1 = arith.constant 0 : i32
    return %c0_i32, %c0_i32_0 : i32, i32
  }
  func.func @transform_2(%arg0: i32) -> (i32, i32) {
    %c0_i32 = arith.constant 0 : i32
    %c0_i32_0 = arith.constant 0 : i32
    %c0_i32_1 = arith.constant 0 : i32
    return %c0_i32, %c0_i32_0 : i32, i32
  }
  func.func @transform_3(%arg0: i32) -> (i32, i32) {
    %c0_i32 = arith.constant 0 : i32
    %c0_i32_0 = arith.constant 0 : i32
    %c0_i32_1 = arith.constant 0 : i32
    return %c0_i32, %c0_i32_0 : i32, i32
  }
  func.func @transform_4(%arg0: i32) -> (i32, i32) {
    %c0_i32 = arith.constant 0 : i32
    %c0_i32_0 = arith.constant 0 : i32
    %c0_i32_1 = arith.constant 0 : i32
    return %c0_i32, %c0_i32_0 : i32, i32
  }
  func.func @transform_5(%arg0: i32) -> (i32, i32) {
    %c0_i32 = arith.constant 0 : i32
    %c0_i32_0 = arith.constant 0 : i32
    %c0_i32_1 = arith.constant 0 : i32
    return %c0_i32, %c0_i32_0 : i32, i32
  }
  func.func @transform_6(%arg0: i32) -> (i32, i32) {
    %c0_i32 = arith.constant 0 : i32
    %c0_i32_0 = arith.constant 0 : i32
    %c0_i32_1 = arith.constant 0 : i32
    return %c0_i32, %c0_i32_0 : i32, i32
  }
  func.func @transform_7(%arg0: i32) -> (i32, i32) {
    %c0_i32 = arith.constant 0 : i32
    %c0_i32_0 = arith.constant 0 : i32
    return %c0_i32, %arg0 : i32, i32
  }
}

</mosaic_0001>

<bundles_post_ra>
// kernel: tpu_custom_call.1
= control target key start
LH: loop header
LB: loop body
LE: loop exit
PB: predicated region body
PF: predicated region fallthrough
CT: control target
= control target key end

     0   :  { %s614_s0 = inlined_call_operand.vmem [shape: bf16[16,128], index: 0, kind: input, shape index: {}]   ;;  %s615_s1 = inlined_call_operand.vmem [shape: bf16[64,16], index: 1, kind: input, shape index: {}]   ;;  %s616_s2 = inlined_call_operand.vmem [shape: f32[64,1], index: 2, kind: input, shape index: {}]   ;;  %s617_s3 = inlined_call_operand.vmem [shape: bf16[32,64], index: 3, kind: input, shape index: {}]   ;;  %s618_s4 = inlined_call_operand.vmem [shape: f32[32,1], index: 4, kind: input, shape index: {}]   ;;  %s619_s5 = inlined_call_operand.vmem [shape: bf16[1,32], index: 5, kind: input, shape index: {}]   ;;  %s620_s6 = inlined_call_operand.<no memory space> [shape: f32[1,1], index: 6, kind: input, shape index: {}]   ;;  %s621_s7 = inlined_call_operand.hbm [shape: f32[1,128], index: 7, kind: output, shape index: {}]  }
   0x1   :  { %v12_v0 = vstv %s620_s6 }
   0x2   :  { %13 = vst [vmem:[#allocation2] sm:$0x1] %v12_v0 }
   0x3   :  { %v401_v1 = vld [vmem:[%s614_s0] sm:$0xff]  ;;  %v44_v2 = vld [vmem:[%s616_s2 + $0x30] sm:$0xff]  ;;  %v450_v3 = vmov 0   ;;  %vm124_vm0 = vcmask 130048  }
   0x4   :  { %405 = vset.pattern.permute.xlu0 %v450_v3  ;;  %v397_v4 = vld [vmem:[%s615_s1 + $0x10] sm:$0xff]  ;;  %406 = vset.pattern.permute.xlu1 %v450_v3  ;;  %v42_v5 = vld [vmem:[%s616_s2 + $0x20] sm:$0xff] }
   0x5   :  { %402 = vmatpush.bf16.msra.mxu3 %v401_v1  ;;  %90 = vperm.xlu0 %405, %v44_v2   ;;  %v395_v6 = vld [vmem:[%s615_s1] sm:$0xff]  ;;  %v40_v7 = vld [vmem:[%s616_s2 + $0x10] sm:$0xff] }
   0x6   :  { %144 = vmatpush.bf16.msra.mxu0 %v401_v1  ;;  %80 = vperm.xlu1 %406, %v42_v5  }
   0x7   :  { %407 = vset.pattern.permute.xlu2 %v450_v3 }
   0x8   :  { %378 = vmatmul.msk.bf16.vlgmr.msra.gmra.mxu3 %vm124_vm0, %v397_v4  ;;  %70 = vperm.xlu2 %407, %v40_v7  }
   0x9   :  { %376 = vmatmul.msk.bf16.vlgmr.msra.gmra.mxu0 %vm124_vm0, %v395_v6 }
   0xa   :  { %14 = vsyncpa [#allocation4], 0  ;;  %v45_v8 = vld [vmem:[%s616_s2 + $0x38] sm:$0xff]  ;;  %v43_v9 = vld [vmem:[%s616_s2 + $0x28] sm:$0xff]  ;;  %vm208_vm1 = vcmask 523264   ;;  %s451_s12 = smov [#allocation3]  }
   0xb   :  { %v41_v10 = vld [vmem:[%s616_s2 + $0x18] sm:$0xff]  ;;  %v38_v11 = vld [vmem:[%s616_s2] sm:$0xff]  ;;  %v39_v12 = vld [vmem:[%s616_s2 + $0x8] sm:$0xff]  ;;  %s345_s13 = sshll.u32 %s451_s12, 4  ;;  %s347_s16 = sshll.u32 %s621_s7, 4  ;;  %s346_s13 = int_to_ptr.vmem [resolvable:$true] %s345_s13  ;;  %s348_s16 = int_to_ptr.hbm [resolvable:$true] %s347_s16 }
   0xc   :  { %v398_v13 = vld [vmem:[%s615_s1 + $0x18] sm:$0xff]  ;;  %v396_v14 = vld [vmem:[%s615_s1 + $0x8] sm:$0xff]  ;;  %v52_v15 = vld [vmem:[%s618_s4 + $0x10] sm:$0xff] }
   0xd   :  { %95 = vperm.xlu0 %405, %v45_v8   ;;  %v53_v16 = vld [vmem:[%s618_s4 + $0x18] sm:$0xff]  ;;  %v50_v17 = vld [vmem:[%s618_s4] sm:$0xff]  ;;  %v51_v18 = vld [vmem:[%s618_s4 + $0x8] sm:$0xff] }
   0xe   :  { %85 = vperm.xlu1 %406, %v43_v9   ;;  %v55_v19 = vld [vmem:[#allocation2] sm:$0x1]  ;;  %v400_v57 = vld [vmem:[%s617_s3 + $0x8] sm:$0xff] }
   0xf   :  { %v399_v56 = vld [vmem:[%s617_s3] sm:$0xff] }
  0x10   :  { %75 = vperm.xlu2 %407, %v41_v10  }
  0x15   :  { %60 = vperm.xlu0 %405, %v38_v11  }
  0x16   :  { %65 = vperm.xlu1 %406, %v39_v12  }
  0x18   :  { %379 = vmatmul.msk.bf16.gmra.mxu3 %vm124_vm0, %v398_v13  ;;  %190 = vperm.xlu2 %407, %v52_v15  }
  0x19   :  { %377 = vmatmul.msk.bf16.gmra.mxu0 %vm124_vm0, %v396_v14 }
  0x1d   :  { %195 = vperm.xlu0 %405, %v53_v16  }
  0x1e   :  { %180 = vperm.xlu1 %406, %v50_v17  }
  0x20   :  { %185 = vperm.xlu2 %407, %v51_v18  }
  0x25   :  { %318 = vperm.xlu0 %405, %v55_v19  }
  0x62   :  { %v71_v28 = vpop.permute.xlu2 %70 }
  0x6a   :  { %v76_v39 = vpop.permute.xlu2 %75 }
  0x72   :  { %v191_v58 = vpop.permute.xlu2 %190 }
  0x77   :  { %v91_v25 = vpop.permute.xlu0 %90 }
  0x78   :  { %v81_v24 = vpop.permute.xlu1 %80 }
  0x7a   :  { %v186_v62 = vpop.permute.xlu2 %185 }
  0x7f   :  { %v96_v30 = vpop.permute.xlu0 %95 }
  0x80   :  { %v86_v29 = vpop.permute.xlu1 %85 }
  0x86   :  { %v146_v20 = vpop.f32.mrf.mxu0 }
  0x87   :  { %v61_v45 = vpop.permute.xlu0 %60 }
  0x88   :  { %v66_v44 = vpop.permute.xlu1 %65  ;;  %v147_v47 = vadd.f32 %v146_v20, %v61_v45 }
  0x8a   :  { %v166_v52 = vmax.f32 %v147_v47, 0.0 }
  0x8b   :  { %v156_v21 = vpop.f32.mrf.mxu3 }
  0x8c   :  { %v157_v36 = vadd.f32 %v156_v21, %v81_v24 }
  0x8e   :  { %v148_v22 = vpop.f32.mrf.mxu0  ;;  %v170_v46 = vmax.f32 %v157_v36, 0.0 }
  0x8f   :  { %v149_v48 = vadd.f32 %v148_v22, %v66_v44  ;;  %v196_v10 = vpop.permute.xlu0 %195 }
  0x90   :  { %v181_v60 = vpop.permute.xlu1 %180 }
  0x91   :  { %v167_v53 = vmax.f32 %v149_v48, 0.0 }
  0x93   :  { %v158_v23 = vpop.f32.mrf.mxu3  ;;  %v174_v55 = vpack.c.bf16 %v167_v53, %v166_v52 }
  0x94   :  { %v159_v33 = vadd.f32 %v158_v23, %v86_v29 }
  0x96   :  { %v151_v26 = vpop.f32.mrf.mxu0  ;;  %v171_v40 = vmax.f32 %v159_v33, 0.0 }
  0x97   :  { %v152_v41 = vadd.f32 %v151_v26, %v71_v28 }
  0x98   :  { %v176_v51 = vpack.c.bf16 %v171_v40, %v170_v46 }
  0x99   :  { %v168_v49 = vmax.f32 %v152_v41, 0.0 }
  0x9b   :  { %v161_v27 = vpop.f32.mrf.mxu3 }
  0x9c   :  { %v162_v31 = vadd.f32 %v161_v27, %v91_v25 }
  0x9e   :  { %v153_v35 = vpop.f32.mrf.mxu0  ;;  %v172_v37 = vmax.f32 %v162_v31, 0.0 }
  0x9f   :  { %v154_v42 = vadd.f32 %v153_v35, %v76_v39 }
  0xa1   :  { %v169_v50 = vmax.f32 %v154_v42, 0.0 }
  0xa3   :  { %v163_v32 = vpop.f32.mrf.mxu3  ;;  %v175_v54 = vpack.c.bf16 %v169_v50, %v168_v49 }
  0xa4   :  { %v164_v34 = vadd.f32 %v163_v32, %v96_v30 }
  0xa6   :  { %v173_v38 = vmax.f32 %v164_v34, 0.0 }
  0xa8   :  { %v177_v43 = vpack.c.bf16 %v173_v38, %v172_v37 }
  0xaa   :  { %219 = vmatpush.bf16.msra.mxu1 %v177_v43 }
  0xae   :  { %220 = vmatpush.bf16.msra.mxu1 %v176_v51 }
  0xb2   :  { %221 = vmatpush.bf16.msra.mxu1 %v175_v54 }
  0xb6   :  { %222 = vmatpush.bf16.msra.mxu1 %v174_v55 }
  0xb9   :  { %388 = vmatmul.msk.bf16.vlgmr.msra.gmra.mxu1 %vm208_vm1, %v399_v56 }
  0xc9   :  { %389 = vmatmul.msk.bf16.gmra.mxu1 %vm208_vm1, %v400_v57 }
 0x136   :  { %v224_v59 = vpop.f32.mrf.mxu1 }
 0x137   :  { %v556_v61 = vadd.f32 %v224_v59, %v181_v60 }
 0x139   :  { %v390_v1 = vmul.f32 -1.442695, %v556_v61 }
 0x13e   :  { %v226_v63 = vpop.f32.mrf.mxu1 }
 0x13f   :  { %v558_v0 = vadd.f32 %v226_v63, %v186_v62 }
 0x141   :  { %v391_v2 = vmul.f32 -1.442695, %v558_v0 }
 0x143   :  { %408 = vpow2.f32 %v391_v2 }
 0x144   :  { %410 = vpow2.f32 %v390_v1 }
 0x146   :  { %v229_v3 = vpop.f32.mrf.mxu1 }
 0x147   :  { %v562_v4 = vadd.f32 %v229_v3, %v191_v58 }
 0x149   :  { %v409_v5 = vpop.eup %408  ;;  %v392_v6 = vmul.f32 -1.442695, %v562_v4 }
 0x14a   :  { %v411_v7 = vpop.eup %410  ;;  %v565_v8 = vadd.f32 1.0, %v409_v5 }
 0x14b   :  { %412 = vpow2.f32 %v392_v6  ;;  %v567_v9 = vadd.f32 1.0, %v411_v7  ;;  %v54_v6 = vld [vmem:[%s619_s5] sm:$0x1]  ;;  %v319_v7 = vpop.permute.xlu0 %318 }
 0x14c   :  { %414 = vrcp.f32 %v565_v8  ;;  %vm270_vm4 = vweird.f32 %v565_v8  ;;  %v274_v38 = vand.u32 2147483647, %v565_v8  ;;  %v276_v39 = vand.u32 2147483648, %v565_v8 }
 0x14d   :  { %416 = vrcp.f32 %v567_v9  ;;  %vm255_vm9 = vweird.f32 %v567_v9  ;;  %v259_v45 = vand.u32 2147483647, %v567_v9  ;;  %v261_v46 = vand.u32 2147483648, %v567_v9 }
 0x14e   :  { %v231_v11 = vpop.f32.mrf.mxu1  ;;  %v277_v52 = vor.u32 1.1754944e-38, %v276_v39  ;;  %vm275_vm15 = vcmp.eq.f32.partialorder %v274_v38, 8.507059e+37 }
 0x14f   :  { %v569_v12 = vadd.f32 %v231_v11, %v196_v10  ;;  %v262_v57 = vor.u32 1.1754944e-38, %v261_v46  ;;  %vm260_vm1 = vcmp.eq.f32.partialorder %v259_v45, 8.507059e+37 }
 0x151   :  { %v413_v13 = vpop.eup %412  ;;  %v393_v14 = vmul.f32 -1.442695, %v569_v12 }
 0x152   :  { %v248_v15 = vadd.f32 1.0, %v413_v13  ;;  %v415_v16 = vpop.eup %414 }
 0x153   :  { %418 = vpow2.f32 %v393_v14  ;;  %v417_v17 = vpop.eup %416  ;;  %v266_v19 = vmul.f32 %v415_v16, %v565_v8  ;;  %vm271_vm5 = vweird.f32 %v415_v16 }
 0x154   :  { %420 = vrcp.f32 %v248_v15  ;;  %v251_v21 = vmul.f32 %v417_v17, %v567_v9  ;;  %vm256_vm3 = vweird.f32 %v417_v17  ;;  %v291_v33 = vand.u32 2147483648, %v248_v15  ;;  %vm591_vm10 = vmor %vm270_vm4, %vm271_vm5 }
 0x155   :  { %v267_v24 = vsub.f32 1.0, %v266_v19  ;;  %vm285_vm6 = vweird.f32 %v248_v15  ;;  %v289_v35 = vand.u32 2147483647, %v248_v15  ;;  %vm596_vm11 = vmor %vm255_vm9, %vm256_vm3 }
 0x156   :  { %v252_v26 = vsub.f32 1.0, %v251_v21  ;;  %v292_v48 = vor.u32 1.1754944e-38, %v291_v33 }
 0x157   :  { %v268_v28 = vmul.f32 %v415_v16, %v267_v24  ;;  %vm290_vm12 = vcmp.eq.f32.partialorder %v289_v35, 8.507059e+37 }
 0x158   :  { %v253_v30 = vmul.f32 %v417_v17, %v252_v26 }
 0x159   :  { %v419_v18 = vpop.eup %418  ;;  %v269_v34 = vadd.f32 %v415_v16, %v268_v28 }
 0x15a   :  { %v421_v20 = vpop.eup %420  ;;  %v249_v22 = vadd.f32 1.0, %v419_v18  ;;  %v254_v37 = vadd.f32 %v417_v17, %v253_v30 }
 0x15b   :  { %v281_v23 = vmul.f32 %v421_v20, %v248_v15  ;;  %vm286_vm2 = vweird.f32 %v421_v20  ;;  %v273_v50 = vsel %vm591_vm10, %v415_v16, %v269_v34 }
 0x15c   :  { %422 = vrcp.f32 %v249_v22  ;;  %vm579_vm7 = vmor %vm285_vm6, %vm286_vm2  ;;  %v306_v41 = vand.u32 2147483648, %v249_v22  ;;  %v304_v44 = vand.u32 2147483647, %v249_v22  ;;  %vm300_vm13 = vweird.f32 %v249_v22 }
 0x15d   :  { %v282_v25 = vsub.f32 1.0, %v281_v23  ;;  %v258_v55 = vsel %vm596_vm11, %v417_v17, %v254_v37  ;;  %v278_v58 = vsel %vm275_vm15, %v277_v52, %v273_v50  ;;  %vm322_vm2 = vcmask 261120  }
 0x15e   :  { %v307_v54 = vor.u32 1.1754944e-38, %v306_v41  ;;  %vm305_vm0 = vcmp.eq.f32.partialorder %v304_v44, 8.507059e+37  ;;  %v263_v63 = vsel %vm260_vm1, %v262_v57, %v258_v55  ;;  %v311_v1 = vmul.f32 %v278_v58, %v558_v0 }
 0x15f   :  { %v283_v27 = vmul.f32 %v421_v20, %v282_v25  ;;  %v310_v3 = vmul.f32 %v263_v63, %v556_v61  ;;  %v321_v0 = vperm.slane %v319_v7, 0 }
 0x161   :  { %v284_v31 = vadd.f32 %v421_v20, %v283_v27  ;;  %v314_v5 = vpack.c.bf16 %v311_v1, %v310_v3 }
 0x162   :  { %v423_v29 = vpop.eup %422 }
 0x163   :  { %v296_v32 = vmul.f32 %v423_v29, %v249_v22  ;;  %v288_v42 = vsel %vm579_vm7, %v421_v20, %v284_v31  ;;  %vm301_vm8 = vweird.f32 %v423_v29 }
 0x164   :  { %v293_v53 = vsel %vm290_vm12, %v292_v48, %v288_v42  ;;  %vm302_vm14 = vmor %vm300_vm13, %vm301_vm8 }
 0x165   :  { %v297_v36 = vsub.f32 1.0, %v296_v32  ;;  %v312_v60 = vmul.f32 %v293_v53, %v562_v4 }
 0x167   :  { %v298_v43 = vmul.f32 %v423_v29, %v297_v36 }
 0x169   :  { %v299_v51 = vadd.f32 %v423_v29, %v298_v43 }
 0x16b   :  { %v303_v56 = vsel %vm302_vm14, %v423_v29, %v299_v51 }
 0x16c   :  { %v308_v59 = vsel %vm305_vm0, %v307_v54, %v303_v56 }
 0x16d   :  { %v313_v62 = vmul.f32 %v308_v59, %v569_v12 }
 0x16f   :  { %v315_v2 = vpack.c.bf16 %v313_v62, %v312_v60 }
 0x171   :  { %332 = vmatpush.bf16.msra.mxu2 %v315_v2 }
 0x175   :  { %333 = vmatpush.bf16.msra.mxu2 %v314_v5 }
 0x178   :  { %394 = vmatmul.msk.bf16.vlgmr.msra.gmra.mxu2 %vm322_vm2, %v54_v6 }
 0x1fb   :  { %v335_v4 = vpop.f32.mrf.mxu2 }
 0x1fc   :  { %v336_v8 = vadd.f32 %v335_v4, %v321_v0 }
 0x1fe   :  { %339 = vst [vmem:[#allocation3] sm:$0x1] %v336_v8 }
 0x1ff   :  { %350 = dma.vmem_to_hbm [thread:$0]  %s346_s13, 16, %s348_s16, [#allocation4]  }
 0x203   :  { %v337_v61 = vpop.f32.mrf.mxu2 }
 0x204   :  { %448 = dma.done.wait [#allocation4], 16  }
 0x205   :  { %449 = vsyncadd [#allocation4], 4294967280 }
 0x206   :  { %355 = vsyncpa [#allocation4], 1 }

</bundles_post_ra>
